<compile_context>
chip_gen: v6e
topology: v6e:2x2x1
jax: 0.10.0
libtpu: 0.0.40
codegen_flags: <defaults>
</compile_context>

<pallas_src>
import functools
import math

import jax
import jax.numpy as jnp
from jax.experimental import pallas as pl
from jax.experimental.pallas import tpu as pltpu


def _expanding_attention_kernel(x_ref, m_ref, wv_ref, geo_ref, o_ref, *, seq_len):
    """One grid step == one batch element.  All operands live in VMEM.

    x_ref  : (T, C)  activations for this batch element
    m_ref  : (C, C)  folded query/key weight  M = (W_q / sqrt(head_dim)) @ W_k^T
    wv_ref : (1, C)  value weight as a lane-dense row (W_v^T)
    geo_ref: (T, 1)  geometric prior column with the self position pre-masked to -inf
    o_ref  : (1, 1)  output
    """
    T = seq_len
    x = x_ref[...]                                                    # (T, C)
    x_last = x_ref[T - 1:T, :]                                        # (1, C) only last query row is used

    # Combined query*key projection of the last row: c = x_last @ M.  This is the
    # only MXU op left (tiny); everything downstream stays VPU/XLU and lane-dense.
    c = jnp.dot(x_last, m_ref[...], preferred_element_type=jnp.float32)   # (1, C)

    # scores_t = <x_last W_q, x_t W_k> / sqrt(hd) = <c, x_t>: VPU mult + lane reduce,
    # column oriented so the whole epilogue is transpose-free.
    scores = jnp.sum(x * c, axis=-1, keepdims=True)                   # (T, 1)
    # Value projection in the same orientation (avoids an N=1 MXU matmul).
    v_col = jnp.sum(x * wv_ref[...], axis=-1, keepdims=True)          # (T, 1)

    # Geometric prior + self mask were folded into geo_ref on the host.
    logits = scores + geo_ref[...]                                    # (T, 1)

    # Softmax over the T keys (sublane axis) fused with the value contraction:
    # y = sum(p * v) / sum(p).
    m = jnp.max(logits, axis=0, keepdims=True)                        # (1, 1)
    p = jnp.exp(logits - m)                                           # (T, 1)
    num = jnp.sum(p * v_col, axis=0, keepdims=True)                   # (1, 1)
    den = jnp.sum(p, axis=0, keepdims=True)                           # (1, 1)
    o_ref[...] = (num * pl.reciprocal(den, approx=False)).astype(o_ref.dtype)


def get_truncated_window(alpha, beta):
    p = alpha / (alpha + beta)
    return math.log(0.05) / math.log(1.0 - p)


def expanding_attention(x, w_attn, alpha, beta, n_head=1):
    B, T, C = x.shape
    assert C % n_head == 0
    assert n_head == 1, "reference module only supports n_head=1"
    assert T >= 2, ("T == 1 leaves only the masked self position -> all logits -inf "
                    "(NaN); same pathology as the reference, rejected up front")
    head_dim = C // n_head
    scale = 1.0 / math.sqrt(head_dim)

    # Expanding-window loop of the reference: alpha/beta are the (constant) learned
    # parameters, so k and window are compile-time constants here.
    k_window = get_truncated_window(float(alpha), float(beta))
    window = int(math.ceil(k_window))
    if window < T:
        # TODO(synk): the reference's multi-iteration expanding-window loop uses
        # data-dependent (dynamic) window sizes, which static Pallas block shapes
        # cannot express; only the single-iteration regime (window >= T, true for the
        # init alpha=0.1/beta=0.9 whenever T <= 28) is lowered.
        raise NotImplementedError(
            f"window={window} < T={T}: multi-iteration expanding-window regime is "
            "not supported by this kernel")
    n_xs = min(window, T)   # == T in the supported regime

    # ---- Host-side (once-per-parameter) operand preparation ---------------------
    f32 = jnp.float32
    w_q = w_attn[:, :C].astype(f32) * f32(scale)        # (C, C), 1/sqrt(head_dim) folded
    w_k = w_attn[:, C:2 * C].astype(f32)                # (C, C)
    w_v = w_attn[:, 2 * C:2 * C + 1].T.astype(f32)      # (1, C) lane-dense value row
    # Fold query & key projections into one parameter-only matrix:
    # scores_t = x_last (W_q W_k^T / sqrt(hd)) x_t^T.
    m_qk = w_q @ w_k.T                                   # (C, C)
    # Geometric prior column: geo[j] = -(n_xs-1-j)/k, with the self position masked.
    idx = jnp.arange(T, dtype=f32)
    geo = -(f32(n_xs - 1) - idx) / f32(k_window)
    geo = jnp.where(idx == T - 1, -jnp.inf, geo).reshape(T, 1)

    kernel = functools.partial(_expanding_attention_kernel, seq_len=T)

    # Advisory cost so XLA can overlap this sub-microsecond call with surrounding HLO.
    cost = pl.CostEstimate(
        flops=B * (2 * C * C + 4 * T * C + 6 * T),
        transcendentals=B * T,
        bytes_accessed=4 * (B * T * C + C * C + C + T + B))

    return pl.pallas_call(
        kernel,
        out_shape=jax.ShapeDtypeStruct((B, 1, 1), x.dtype),
        grid_spec=pltpu.PrefetchScalarGridSpec(
            num_scalar_prefetch=0,
            grid=(B,),
            in_specs=[
                pl.BlockSpec((None, T, C), lambda b: (b, 0, 0)),   # x, one batch/step
                pl.BlockSpec((C, C), lambda b: (0, 0)),            # folded W_q W_k^T (shared, resident)
                pl.BlockSpec((1, C), lambda b: (0, 0)),            # W_v row (shared)
                pl.BlockSpec((T, 1), lambda b: (0, 0)),            # geo prior column
            ],
            out_specs=pl.BlockSpec((None, 1, 1), lambda b: (b, 0, 0)),
        ),
        # Each batch element is independent -> parallel grid axis (lets v7x shard the
        # grid across both TensorCores when B > 1).
        compiler_params=pltpu.CompilerParams(
            dimension_semantics=("parallel",)),
        cost_estimate=cost,
    )(x, m_qk, w_v, geo)


def reference_jax(x, w_attn, alpha, beta):
    """Pure-JAX reference of the intended forward (for a correctness check)."""
    B, T, C = x.shape
    qkv = x @ w_attn
    q, k, v = qkv[..., :C], qkv[..., C:2 * C], qkv[..., 2 * C:2 * C + 1]
    scale = 1.0 / math.sqrt(C)
    scores = jnp.einsum('btc,bsc->bts', q, k) * scale                # (B, T, T)
    scores_last = scores[:, -1, :]                                   # last query row
    scores_last = scores_last.at[:, -1].set(-jnp.inf)                # mask self
    k_w = get_truncated_window(float(alpha), float(beta))
    geo = -jnp.arange(T - 1, -1, -1, dtype=jnp.float32) / k_w
    att = jax.nn.softmax(scores_last + geo, axis=-1)                 # (B, T)
    y = jnp.einsum('bt,bto->bo', att, v)                             # (B, 1)
    return y.reshape(B, 1, 1)


if __name__ == "__main__":
    # Small shapes consistent with the module (n_head=1 forced by the code; T <= 28
    # keeps the expanding-window loop in its single-iteration regime).
    B, T, C, n_head = 2, 16, 32, 1
    key = jax.random.PRNGKey(0)
    kx, kw = jax.random.split(key)
    x = jax.random.normal(kx, (B, T, C), dtype=jnp.float32)
    w_attn = 0.02 * jax.random.normal(kw, (C, 2 * C + 1), dtype=jnp.float32)
    alpha, beta = 0.1, 0.9   # nn.Parameter(0.1), nn.Parameter(0.9)

    y = expanding_attention(x, w_attn, alpha, beta, n_head=n_head)
    y = jax.block_until_ready(y)

    y_ref = reference_jax(x, w_attn, alpha, beta)
    assert y.shape == (B, 1, 1), y.shape
    assert bool(jnp.all(jnp.isfinite(y)))
    assert bool(jnp.allclose(y, y_ref, atol=1e-3, rtol=1e-2)), (y, y_ref)

    print("KERNEL_OK")
</pallas_src>

<mosaic_0001>
module attributes {stable_mosaic.version = 11 : i64} {
  func.func @_expanding_attention_kernel(%arg0: i32, %arg1: memref<1x16x32xf32, #tpu.memory_space<vmem>>, %arg2: memref<32x32xf32, #tpu.memory_space<vmem>>, %arg3: memref<1x32xf32, #tpu.memory_space<vmem>>, %arg4: memref<16x1xf32, #tpu.memory_space<vmem>>, %arg5: memref<1x1x1xf32, #tpu.memory_space<vmem>>) attributes {dimension_semantics = [#tpu.dimension_semantics<parallel>], iteration_bounds = array<i64: 2>, scalar_prefetch = 0 : i64, scratch_operands = 0 : i64, tpu.core_type = #tpu.core_type<tc>, window_params = [{transform_indices = @transform_0, window_bounds = array<i64: 1, 16, 32>}, {pipeline_mode = #tpu.pipeline_mode<synchronous>, transform_indices = @transform_1, window_bounds = array<i64: 32, 32>}, {pipeline_mode = #tpu.pipeline_mode<synchronous>, transform_indices = @transform_2, window_bounds = array<i64: 1, 32>}, {pipeline_mode = #tpu.pipeline_mode<synchronous>, transform_indices = @transform_3, window_bounds = array<i64: 16, 1>}, {transform_indices = @transform_4, window_bounds = array<i64: 1, 1, 1>}]} {
    %c0 = arith.constant 0 : index
    %c0_0 = arith.constant 0 : index
    %c0_1 = arith.constant 0 : index
    %0 = vector.load %arg1[%c0, %c0_0, %c0_1] : memref<1x16x32xf32, #tpu.memory_space<vmem>>, vector<1x16x32xf32>
    %1 = vector.shape_cast %0 : vector<1x16x32xf32> to vector<16x32xf32>
    %c0_2 = arith.constant 0 : index
    %c15 = arith.constant 15 : index
    %c0_3 = arith.constant 0 : index
    %2 = vector.load %arg1[%c0_2, %c15, %c0_3] : memref<1x16x32xf32, #tpu.memory_space<vmem>>, vector<1x1x32xf32>
    %3 = vector.shape_cast %2 : vector<1x1x32xf32> to vector<1x32xf32>
    %c0_4 = arith.constant 0 : index
    %c0_5 = arith.constant 0 : index
    %4 = vector.load %arg2[%c0_4, %c0_5] : memref<32x32xf32, #tpu.memory_space<vmem>>, vector<32x32xf32>
    %cst = arith.constant dense<0.000000e+00> : vector<1x32xf32>
    %5 = tpu.matmul %3, %4, %cst {dimension_numbers = #tpu.dot_dimension_numbers<[1], [0], [0], [1], [0, 0, 1, 1], [], []>} : vector<1x32xf32>, vector<32x32xf32>, vector<1x32xf32> -> vector<1x32xf32>
    %6 = vector.broadcast %5 : vector<1x32xf32> to vector<16x32xf32>
    %7 = arith.mulf %1, %6 : vector<16x32xf32>
    %cst_6 = arith.constant dense<0.000000e+00> : vector<16xf32>
    %8 = vector.multi_reduction <add>, %7, %cst_6 [1] : vector<16x32xf32> to vector<16xf32>
    %9 = vector.shape_cast %8 : vector<16xf32> to vector<16x1xf32>
    %c0_7 = arith.constant 0 : index
    %c0_8 = arith.constant 0 : index
    %10 = vector.load %arg3[%c0_7, %c0_8] : memref<1x32xf32, #tpu.memory_space<vmem>>, vector<1x32xf32>
    %11 = vector.broadcast %10 : vector<1x32xf32> to vector<16x32xf32>
    %12 = arith.mulf %1, %11 : vector<16x32xf32>
    %cst_9 = arith.constant dense<0.000000e+00> : vector<16xf32>
    %13 = vector.multi_reduction <add>, %12, %cst_9 [1] : vector<16x32xf32> to vector<16xf32>
    %14 = vector.shape_cast %13 : vector<16xf32> to vector<16x1xf32>
    %c0_10 = arith.constant 0 : index
    %c0_11 = arith.constant 0 : index
    %15 = vector.load %arg4[%c0_10, %c0_11] : memref<16x1xf32, #tpu.memory_space<vmem>>, vector<16x1xf32>
    %16 = arith.addf %9, %15 : vector<16x1xf32>
    %cst_12 = arith.constant dense<0xFF800000> : vector<1xf32>
    %17 = vector.multi_reduction <maximumf>, %16, %cst_12 [0] : vector<16x1xf32> to vector<1xf32>
    %18 = vector.shape_cast %17 : vector<1xf32> to vector<1x1xf32>
    %19 = vector.broadcast %18 : vector<1x1xf32> to vector<16x1xf32>
    %20 = arith.subf %16, %19 : vector<16x1xf32>
    %21 = math.exp %20 : vector<16x1xf32>
    %22 = arith.mulf %21, %14 : vector<16x1xf32>
    %cst_13 = arith.constant dense<0.000000e+00> : vector<1xf32>
    %23 = vector.multi_reduction <add>, %22, %cst_13 [0] : vector<16x1xf32> to vector<1xf32>
    %24 = vector.shape_cast %23 : vector<1xf32> to vector<1x1xf32>
    %cst_14 = arith.constant dense<0.000000e+00> : vector<1xf32>
    %25 = vector.multi_reduction <add>, %21, %cst_14 [0] : vector<16x1xf32> to vector<1xf32>
    %26 = vector.shape_cast %25 : vector<1xf32> to vector<1x1xf32>
    %27 = tpu.reciprocal %26 : vector<1x1xf32> -> vector<1x1xf32>
    %28 = arith.mulf %24, %27 : vector<1x1xf32>
    %c0_15 = arith.constant 0 : index
    %c0_16 = arith.constant 0 : index
    %c0_17 = arith.constant 0 : index
    %29 = vector.load %arg5[%c0_15, %c0_16, %c0_17] : memref<1x1x1xf32, #tpu.memory_space<vmem>>, vector<1x1x1xf32>
    %30 = vector.shape_cast %29 : vector<1x1x1xf32> to vector<1x1xf32>
    %31 = vector.shape_cast %28 : vector<1x1xf32> to vector<1x1x1xf32>
    tpu.vector_store %arg5[%c0_15, %c0_16, %c0_17], %31 {strides = array<i32>} : memref<1x1x1xf32, #tpu.memory_space<vmem>>, vector<1x1x1xf32>,
    return
  }
  func.func @transform_0(%arg0: i32) -> (i32, i32, i32) {
    %c0_i32 = arith.constant 0 : i32
    %c0_i32_0 = arith.constant 0 : i32
    %c0_i32_1 = arith.constant 0 : i32
    return %arg0, %c0_i32, %c0_i32_0 : i32, i32, i32
  }
  func.func @transform_1(%arg0: i32) -> (i32, i32) {
    %c0_i32 = arith.constant 0 : i32
    %c0_i32_0 = arith.constant 0 : i32
    %c0_i32_1 = arith.constant 0 : i32
    return %c0_i32, %c0_i32_0 : i32, i32
  }
  func.func @transform_2(%arg0: i32) -> (i32, i32) {
    %c0_i32 = arith.constant 0 : i32
    %c0_i32_0 = arith.constant 0 : i32
    %c0_i32_1 = arith.constant 0 : i32
    return %c0_i32, %c0_i32_0 : i32, i32
  }
  func.func @transform_3(%arg0: i32) -> (i32, i32) {
    %c0_i32 = arith.constant 0 : i32
    %c0_i32_0 = arith.constant 0 : i32
    %c0_i32_1 = arith.constant 0 : i32
    return %c0_i32, %c0_i32_0 : i32, i32
  }
  func.func @transform_4(%arg0: i32) -> (i32, i32, i32) {
    %c0_i32 = arith.constant 0 : i32
    %c0_i32_0 = arith.constant 0 : i32
    %c0_i32_1 = arith.constant 0 : i32
    return %arg0, %c0_i32, %c0_i32_0 : i32, i32, i32
  }
}

</mosaic_0001>

<bundles_post_ra>
// kernel: tpu_custom_call.1
= control target key start
LH: loop header
LB: loop body
LE: loop exit
PB: predicated region body
PF: predicated region fallthrough
CT: control target
= control target key end

     0   :  { %9 = vsyncpa [#allocation3], 0  ;;  %s818_s0 = inlined_call_operand.hbm [shape: f32[2,16,32], index: 0, kind: input, shape index: {}]   ;;  %s819_s1 = inlined_call_operand.hbm [shape: f32[32,32], index: 1, kind: input, shape index: {}]   ;;  %s820_s2 = inlined_call_operand.vmem [shape: f32[1,32], index: 2, kind: input, shape index: {}]   ;;  %s821_s3 = inlined_call_operand.vmem [shape: f32[16,1], index: 3, kind: input, shape index: {}]   ;;  %s822_s4 = inlined_call_operand.vmem [shape: f32[2,1,1], index: 4, kind: output, shape index: {}]  }
   0x1   :  { %11 = vsyncpa [#allocation3 + $0x1], 0 }
   0x2   :  { %12 = vsyncpa [#allocation5], 0  ;;  %s666_s15 = smov 0   ;;  %s668_s16 = smov 0  }
   0x3   :  { %s670_s17 = smov 0   ;;  %s672_s18 = smov 0  }
   0x4 LB: > { %s685_s19 = sadd.s32 4294967295, %s633_s18   ;;  %p38_p0 = scmp.ne.s32.totalorder %s625_s16, %s621_s15  ;;  %s633_s18 = sphi %s672_s18, %s837_s18   ;;  %s629_s17 = sphi %s670_s17, %s836_s17   ;;  %s625_s16 = sphi %s668_s16, %s835_s16   ;;  %s621_s15 = sphi %s666_s15, %s834_s15  }
   0x5   : > { %p823_p1 = scmp.eq.s32.totalorder %s685_s19, 0  ;;  %p451_p2 = scmp.ge.s32.totalorder %s633_s18, 1 }
   0x6   : > { %p138_p3 = scmp.lt.s32.totalorder %s633_s18, 3  ;;  %s635_s22 = smov [#allocation4]  }
   0x7   : > { %p693_p4 = por %p823_p1, %p38_p0  ;;  %s150_s23 = sshll.u32 %s635_s22, 4  ;;  %s151_s23 = int_to_ptr.vmem [resolvable:$true] %s150_s23 }
   0x8   : > { %p697_p5 = pnand %p451_p2, %p138_p3  ;;  %s710_s25 = sadd.s32 1, %s633_s18  }
   0x9   : > { %s826_s20 = scalar_select %p693_p4, 1, 0 }
   0xa   : > { %s827_s21 = scalar_select %p697_p5, 1, 0 }
   0xb   : > { %p487_p6 = pneg %p697_p5  ;;  %s25_s26 = sadd.s32 1, %s629_s17 }
   0xc   : > { %s22_s27 = ssub.s32 %s633_s18, %s710_s25  ;;  %s552_s28 = scalar_lea.vmem %s151_s23, 512 }
   0xd   : > { %p705_p7 = pnand %p487_p6, %p823_p1  ;;  %p553_p9 = scmp.ne.s32.totalorder %s151_s23, %s552_s28 }
   0xe   : > { %p560_p12 = scmp.lt.s32.totalorder %s151_s23, %s151_s23  ;;  %p561_p13 = scmp.lt.s32.totalorder %s552_s28, %s552_s28 }
   0xf   : > { %p543_p8 = pneg %p705_p7 }
  0x10   : > { %p562_p0 = por %p561_p13, %p560_p12 }
  0x11   : > { %p555_p10 = pnand %p553_p9, %p543_p8 }
  0x13   : > { %p556_p11 = pneg %p555_p10 }
  0x15   : > { %p563_p2 = pnand %p562_p0, %p556_p11 }
  0x17   : > { %566 = shalt.err (!%p563_p2)
}
  0x18   : > { %s636_s29 = smov 128   ;;  %s637_s30 = smov 8  }
  0x19   : > { %490 = dma.hbm_to_vmem [thread:$0]  (!%p705_p7), %s819_s1, 512, %s151_s23, [#allocation5], %s636_s29, %s636_s29, %s637_s30  }
  0x1a   : > { %p23_p3 = scmp.eq.s32.totalorder %s22_s27, 0  ;;  %p32_p6 = scmp.ne.s32.totalorder %s629_s17, %s625_s16 }
  0x1b   : > { %p33_p8 = scmp.eq.s32.totalorder %s633_s18, 0  ;;  %p496_p9 = scmp.lt.s32.totalorder %s633_s18, 2 }
  0x1c   : > { %s730_s7 = scalar_select %p23_p3, %s629_s17, %s25_s26  }
  0x1d   : > { %p34_p10 = por %p33_p8, %p32_p6  ;;  %s170_s8 = sand.u32 1, %s629_s17  }
  0x1e   : > { %s454_s9 = sshll.u32 %s170_s8, 4  ;;  %s464_s10 = sshll.u32 %s633_s18, 8 }
  0x1f   : > { %s737_s13 = scalar_lea.hbm %s818_s0, %s464_s10  ;;  %s174_s14 = scalar_lea.vmem [#allocation2], %s454_s9 }
  0x20   : > { %s181_s15 = sshll.u32 %s174_s14, 4  ;;  %p741_p7 = pnand %p496_p9, %p34_p10  ;;  %s739_s15 = int_to_ptr.vmem [resolvable:$true] %s181_s15 }
  0x21   : > { %s745_s23 = scalar_lea.sflag [#allocation3], %s170_s8  ;;  %s567_s18 = scalar_lea.hbm %s737_s13, 256 }
  0x22   : > { %p568_p11 = scmp.ne.s32.totalorder %s737_s13, %s567_s18  ;;  %p569_p12 = pneg %p741_p7 }
  0x23   : > { %s572_s27 = scalar_lea.hbm %s818_s0, 512  ;;  %p573_p2 = scmp.lt.s32.totalorder %s737_s13, %s818_s0 }
  0x24   : > { %p570_p13 = pnand %p569_p12, %p568_p11  ;;  %p574_p3 = scmp.lt.s32.totalorder %s572_s27, %s567_s18 }
  0x26   : > { %p571_p0 = pneg %p570_p13  ;;  %p575_p6 = por %p574_p3, %p573_p2 }
  0x28   : > { %p576_p8 = pnand %p575_p6, %p571_p0 }
  0x2a   : > { %579 = shalt.err (!%p576_p8)
}
  0x2b   : > { %s580_s6 = scalar_lea.vmem %s739_s15, 256  ;;  %s638_s8 = smov [#allocation2]  }
  0x2c   : > { %p581_p9 = scmp.ne.s32.totalorder %s739_s15, %s580_s6  ;;  %s585_s9 = sshll.u32 %s638_s8, 4  ;;  %s586_s9 = int_to_ptr.vmem [resolvable:$false] %s585_s9 }
  0x2d   : > { %s587_s10 = scalar_lea.vmem %s586_s9, 512  ;;  %p588_p13 = scmp.lt.s32.totalorder %s739_s15, %s586_s9 }
  0x2e   : > { %p583_p10 = pnand %p581_p9, %p569_p12  ;;  %p589_p1 = scmp.lt.s32.totalorder %s587_s10, %s580_s6 }
  0x30   : > { %p584_p11 = pneg %p583_p10  ;;  %p590_p4 = por %p589_p1, %p588_p13 }
  0x32   : > { %p591_p5 = pnand %p590_p4, %p584_p11 }
  0x34   : > { %594 = shalt.err (!%p591_p5)
}
  0x35   : > { %494 = dma.hbm_to_vmem [thread:$0]  (!%p741_p7), %s737_s13, 256, %s739_s15, %s745_s23, %s636_s29, %s636_s29, %s637_s30  }
  0x36   : > { %p830_p12 = scmp.ne.s32.totalorder %s827_s21, 0 }
  0x37   : > { %s195_s11 = sand.u32 (!%p830_p12), 1, %s625_s16   ;;  %p831_p1 = scmp.ne.s32.totalorder (!%p830_p12), %s826_s20, 0 }
  0x38   : > { %193 = sbr.rel (%p830_p12) target bundleno = 482 (0x1e2), region = 36  ;;  %s458_s12 = sshll.u32 (!%p830_p12), %s195_s11, 4 }
  0x39   : > { %s196_s14 = scalar_lea.sflag (!%p830_p12), [#allocation3], %s195_s11  ;;  %s199_s18 = scalar_lea.vmem (!%p830_p12), [#allocation2], %s458_s12 }
  0x3d   : > { %612 = dma.done.wait (%p831_p1), %s196_s14, 256  }
  0x3e   : > { %614 = vsyncadd (%p831_p1), %s196_s14, 4294967040  ;;  %p832_p4 = scmp.eq.s32.totalorder %s685_s19, 0 }
  0x40   : > { %616 = dma.done.wait (%p832_p4), [#allocation5], 512   ;;  %p833_p5 = pmov %p832_p4 }
  0x41   : > { %v639_v0 = vmov 0.0   ;;  %vm640_vm0 = vmmov 0   ;;  %v235_v1 = vld [vmem:[#allocation4 + $0x18] sm:$0xff]  ;;  %v234_v2 = vld [vmem:[#allocation4 + $0x10] sm:$0xff]  ;;  %v233_v3 = vld [vmem:[#allocation4 + $0x8] sm:$0xff]  ;;  %vm236_vm1 = vcmask 261120   ;;  %v310_v13 = vlaneseq }
  0x42   : > { %618 = vsyncadd (%p833_p5), [#allocation5], 4294966784  ;;  %470 = vmatprep.subr.mxu0 %v639_v0  ;;  %478 = vmatprep.mubr.msk.f32.mxu0 %vm640_vm0, %v639_v0  ;;  %v232_v4 = vld [vmem:[#allocation4] sm:$0xff]  ;;  %v231_v5 = vld [vmem:[%s199_s18 + $0xf] sm:$0x1]  ;;  %vm341_vm2 = vcmask 7168  }
  0x43   : > { %471 = vmatpush3.msra.mxu0 %v235_v1  ;;  %v229_v6 = vld [vmem:[%s199_s18] sm:$0xff]  ;;  %v230_v7 = vld [vmem:[%s199_s18 + $0x8] sm:$0xff]  ;;  %v311_v14 = vshrl.u32 %v310_v13, 7  ;;  %p226_p7 = scmp.lt.s32.totalorder %s685_s19, 1  ;;  %vm379_vm3 = vcmask 0  }
  0x44   : > { %472 = vmatprep.subr.mxu0 %v639_v0  ;;  %v461_v8 = vld [vmem:[%s820_s2] ss:$0 sm:$0xff]  ;;  %v338_v25 = vld [vmem:[%s821_s3 + $0x8] sm:$0xff] }
  0x45   : > { %473 = vmatpush3.msra.mxu0 %v234_v2  ;;  %v329_v9 = vmul.f32 %v461_v8, %v229_v6  ;;  %v330_v10 = vmul.f32 %v461_v8, %v230_v7  ;;  %v312_v15 = vsub.s32 0, %v311_v14  ;;  %v337_v23 = vld [vmem:[%s821_s3] sm:$0xff]  ;;  %s839_s19 = smov (!%p226_p7, %s685_s19), 1 }
  0x46   : > { %474 = vmatprep.subr.mxu0 %v639_v0  ;;  %s228_s24 = scalar_lea.vmem %s822_s4, %s839_s19 }
  0x47   : > { %475 = vmatpush3.msra.mxu0 %v233_v3  ;;  %v331_v11 = vsel %vm236_vm1, %v329_v9, 0.0  ;;  %v334_v12 = vsel %vm236_vm1, %v330_v10, 0.0 }
  0x48   : > { %476 = vmatprep.subr.mxu0 %v639_v0  ;;  %332 = vadd.xlane.f32.xlu1 %v331_v11 }
  0x49   : > { %477 = vmatpush3.msra.mxu0 %v232_v4 }
  0x4a   : > { %479 = vmatmul.mubr.msk.f32.vlgmr.msra.gmra.mxu0 %vm236_vm1, %v231_v5 }
  0x4c   : > { %335 = vadd.xlane.f32.xlu1 %v334_v12 }
  0xd1   : > { %v333_v42 = vpop.xlane.xlu1 %332 }
  0xd5   : > { %v336_v43 = vpop.xlane.xlu1 %335 }
 0x10a   : > { %v306_v16 = vpop.f32.mrf.mxu0 }
 0x10b   : > { %v313_v17 = vrot.slane %v306_v16, %v312_v15 }
 0x10c   : > { %v480_v18 = vpop.f32.mrf.mxu0 }
 0x10d   : > { %v314_v19 = vmul.f32 %v313_v17, %v229_v6  ;;  %v315_v21 = vmul.f32 %v313_v17, %v230_v7 }
 0x10f   : > { %v316_v20 = vsel %vm236_vm1, %v314_v19, 0.0  ;;  %v319_v22 = vsel %vm236_vm1, %v315_v21, 0.0 }
 0x110   : > { %317 = vadd.xlane.f32.xlu0 %v316_v20 }
 0x114   : > { %320 = vadd.xlane.f32.xlu0 %v319_v22 }
 0x199   : > { %v318_v24 = vpop.xlane.xlu0 %317 }
 0x19a   : > { %v339_v26 = vadd.f32 %v337_v23, %v318_v24 }
 0x19c   : > { %v342_v29 = vsel %vm341_vm2, %v339_v26, -inf }
 0x19d   : > { %v321_v27 = vpop.xlane.xlu0 %320 }
 0x19e   : > { %v340_v28 = vadd.f32 %v338_v25, %v321_v27 }
 0x1a0   : > { %v343_v30 = vsel %vm341_vm2, %v340_v28, -inf }
 0x1a1   : > { %v344_v31 = vmax.f32 %v342_v29, %v343_v30 }
 0x1a3   : > { %v345_v32 = vrot.slane %v344_v31, 4 }
 0x1a5   : > { %v346_v33 = vmax.f32 %v344_v31, %v345_v32 }
 0x1a7   : > { %v347_v34 = vrot.slane %v346_v33, 2 }
 0x1a9   : > { %v348_v35 = vmax.f32 %v346_v33, %v347_v34 }
 0x1ab   : > { %v349_v36 = vrot.slane %v348_v35, 1 }
 0x1ad   : > { %v350_v37 = vmax.f32 %v348_v35, %v349_v36 }
 0x1af   : > { %v351_v38 = vsub.f32 %v339_v26, %v350_v37  ;;  %v352_v39 = vsub.f32 %v340_v28, %v350_v37 }
 0x1b1   : > { %v353_v40 = vmul.f32 1.442695, %v351_v38  ;;  %v355_v41 = vmul.f32 1.442695, %v352_v39 }
 0x1b3   : > { %535 = vpow2.f32 %v353_v40 }
 0x1b4   : > { %537 = vpow2.f32 %v355_v41 }
 0x1c0   : > { %v536_v44 = vpop.eup %535 }
 0x1c1   : > { %v538_v45 = vpop.eup %537  ;;  %v368_v46 = vsel %vm341_vm2, %v536_v44, 0.0  ;;  %v357_v47 = vmul.f32 %v536_v44, %v333_v42 }
 0x1c2   : > { %v369_v48 = vsel %vm341_vm2, %v538_v45, 0.0  ;;  %v358_v49 = vmul.f32 %v538_v45, %v336_v43 }
 0x1c3   : > { %v370_v50 = vadd.f32 %v369_v48, %v368_v46  ;;  %v359_v51 = vsel %vm341_vm2, %v357_v47, 0.0 }
 0x1c4   : > { %v360_v52 = vsel %vm341_vm2, %v358_v49, 0.0 }
 0x1c5   : > { %v371_v53 = vrot.slane %v370_v50, 4  ;;  %v361_v54 = vadd.f32 %v360_v52, %v359_v51 }
 0x1c7   : > { %v372_v55 = vadd.f32 %v371_v53, %v370_v50  ;;  %v362_v57 = vrot.slane %v361_v54, 4 }
 0x1c9   : > { %v373_v56 = vrot.slane %v372_v55, 2  ;;  %v363_v60 = vadd.f32 %v362_v57, %v361_v54 }
 0x1cb   : > { %v374_v58 = vadd.f32 %v373_v56, %v372_v55  ;;  %v364_v62 = vrot.slane %v363_v60, 2 }
 0x1cd   : > { %v375_v59 = vrot.slane %v374_v58, 1  ;;  %v365_v63 = vadd.f32 %v364_v62, %v363_v60 }
 0x1cf   : > { %v376_v61 = vadd.f32 %v375_v59, %v374_v58  ;;  %v366_v0 = vrot.slane %v365_v63, 1 }
 0x1d1   : > { %539 = vrcp.f32 %v376_v61  ;;  %v367_v1 = vadd.f32 %v366_v0, %v365_v63 }
 0x1de   : > { %v540_v2 = vpop.eup %539 }
 0x1df   : > { %v378_v3 = vmul.f32 %v540_v2, %v367_v1 }
 0x1e1   : > { %380 = vst.msk [vmem:[%s228_s24] sm:$0x1] %vm379_vm3, %v378_v3 }
 0x1e2 PF: > { %p15_p0 = scmp.ge.s32.totalorder %s710_s25, 4   ;;  %s834_s15 = smov %s625_s16 }
 0x1e3   : > { %s835_s16 = smov %s629_s17  ;;  %s836_s17 = smov %s730_s7 }
 0x1e4   : > { %s837_s18 = smov %s710_s25  ;;  %17 = sbr.rel (!%p15_p0) target bundleno = 4 (0x4), region = 80 }
 0x1e9   :  { %398 = vsyncpa [#allocation3], 1 }
 0x1ea   :  { %400 = vsyncpa [#allocation3 + $0x1], 1 }
 0x1eb   :  { %401 = vsyncpa [#allocation5], 1 }

</bundles_post_ra>
